<compile_context>
chip_gen: v5e
topology: v5e:2x2
jax: 0.10.0
libtpu: 0.0.40
codegen_flags: <defaults>
</compile_context>

<pallas_src>
import functools

import numpy as np
import jax
import jax.numpy as jnp
from jax.experimental import pallas as pl
from jax.experimental.pallas import tpu as pltpu

F32 = jnp.float32
BF16 = jnp.bfloat16
LN_EPS = 1e-5


def _round_up(n, m):
    return ((n + m - 1) // m) * m


# ----------------------------- fused FFN kernel ------------------------------
def _ffn_kernel(x_ref, w1_ref, w2_ref, p_ref, o_ref, *, d_in, d_hid, eps):
    # x_ref : (TILE_R, d_in) f32   activation row tile (rows->sublanes, feats->lanes)
    # w1_ref: (d_in, d_hid)  bf16  conv1 weight, VMEM-resident across grid steps
    # w2_ref: (d_hid, d_in)  bf16  conv2 weight, VMEM-resident across grid steps
    # p_ref : (8, P)         f32   row0=b1, row1=b2, row2=gamma, row3=beta (8-row pad)
    # o_ref : (TILE_R, d_in) f32
    x = x_ref[...]
    b1 = p_ref[0:1, :d_hid]
    b2 = p_ref[1:2, :d_in]
    gamma = p_ref[2:3, :d_in]
    beta = p_ref[3:4, :d_in]

    # Conv1d(d_in, d_hid, 1) + ReLU  ==  relu(x @ W1 + b1); bf16 MXU operands, f32 acc.
    h = jnp.dot(x.astype(BF16), w1_ref[...], preferred_element_type=F32) + b1
    h = jnp.maximum(h, 0.0)
    # Conv1d(d_hid, d_in, 1)         ==  h @ W2 + b2; h (largest intermediate) -> bf16.
    y = jnp.dot(h.astype(BF16), w2_ref[...], preferred_element_type=F32) + b2

    # dropout = identity (eval), residual + LayerNorm(d_in); one-pass stats, f32 math.
    z = y + x
    inv_d = 1.0 / d_in
    s = jnp.sum(z, axis=1, keepdims=True)
    sq = jnp.sum(z * z, axis=1, keepdims=True)
    mu = s * inv_d
    var = sq * inv_d - mu * mu
    o_ref[...] = (z - mu) * jax.lax.rsqrt(var + eps) * gamma + beta


def positionwise_ffn(x, w1_bf, w2_bf, pvec, *, d_in, d_hid, eps=LN_EPS, tile_r=512):
    """x: (B, L, d_in) float32 -> (B, L, d_in) float32."""
    B, L, _ = x.shape
    R = B * L
    x2d = x.astype(F32).reshape(R, d_in)

    # Row tile: as large as sensible (>=512 rows ~85% of HBM roofline), multiple of 8.
    tile = min(tile_r, _round_up(R, 8))
    r_pad = _round_up(R, tile)
    if r_pad != R:
        x2d = jnp.pad(x2d, ((0, r_pad - R), (0, 0)))
    grid = (r_pad // tile,)

    p_width = pvec.shape[1]

    # VMEM budget (double-buffered activations, resident weights, hidden intermediate);
    # clamp to stay inside v7x's 64 MiB physical / 32 MiB scoped default.
    vmem_est = (4 * tile * d_in * 4                 # x + out, double-buffered, f32
                + tile * d_hid * (4 + 2)            # hidden f32 + bf16 copy
                + 4 * d_in * d_hid * 2              # two bf16 weight slabs (x2 buffers)
                + 2 * 8 * p_width * 4)              # bias/ln slab
    vmem_limit = int(min(max(2 * vmem_est, 32 * 1024 * 1024), 100 * 1024 * 1024))

    flops = 4 * r_pad * d_in * d_hid + 10 * r_pad * d_in
    bytes_accessed = 2 * r_pad * d_in * 4 + 2 * d_in * d_hid * 2 + 8 * p_width * 4

    out = pl.pallas_call(
        functools.partial(_ffn_kernel, d_in=d_in, d_hid=d_hid, eps=eps),
        out_shape=jax.ShapeDtypeStruct((r_pad, d_in), F32),
        grid_spec=pltpu.PrefetchScalarGridSpec(
            num_scalar_prefetch=0,
            grid=grid,
            in_specs=[
                pl.BlockSpec((tile, d_in), lambda i: (i, 0)),      # activations: tiled
                pl.BlockSpec((d_in, d_hid), lambda i: (0, 0)),     # W1: resident
                pl.BlockSpec((d_hid, d_in), lambda i: (0, 0)),     # W2: resident
                pl.BlockSpec((8, p_width), lambda i: (0, 0)),      # b1/b2/gamma/beta
            ],
            out_specs=pl.BlockSpec((tile, d_in), lambda i: (i, 0)),
        ),
        compiler_params=pltpu.CompilerParams(
            dimension_semantics=("parallel",),
            vmem_limit_bytes=vmem_limit,
        ),
        input_output_aliases={0: 0},
        cost_estimate=pl.CostEstimate(
            flops=flops, transcendentals=r_pad, bytes_accessed=bytes_accessed),
    )(x2d, w1_bf, w2_bf, pvec)
    return out[:R].reshape(B, L, d_in)


# ----------------------------- parameter init --------------------------------
def init_params(key, d_in, d_hid):
    k1, k2, k3, k4 = jax.random.split(key, 4)
    # kaiming-style scales for the two 1x1 convs (values only need to be plausible)
    w1 = jnp.sqrt(2.0 / d_hid) * jax.random.normal(k1, (d_in, d_hid), F32)
    b1 = 0.01 * jax.random.normal(k2, (d_hid,), F32)
    w2 = jnp.sqrt(2.0 / d_hid) * jax.random.normal(k3, (d_hid, d_in), F32)
    b2 = 0.01 * jax.random.normal(k4, (d_in,), F32)
    ln_g = jnp.ones((d_in,), F32)      # nn.LayerNorm defaults
    ln_b = jnp.zeros((d_in,), F32)
    params = dict(w1=w1, b1=b1, w2=w2, b2=b2, ln_g=ln_g, ln_b=ln_b)

    # Pre-pack once at init: bf16 weight slabs for the MXU + one 8-row-aligned f32
    # slab holding b1 / b2 / gamma / beta (no ragged sublane tiles).
    p_width = max(d_in, d_hid)
    pvec = jnp.zeros((8, p_width), F32)
    pvec = pvec.at[0, :d_hid].set(b1)
    pvec = pvec.at[1, :d_in].set(b2)
    pvec = pvec.at[2, :d_in].set(ln_g)
    pvec = pvec.at[3, :d_in].set(ln_b)
    packed = dict(w1=w1.astype(BF16), w2=w2.astype(BF16), pvec=pvec)
    return params, packed


# ----------------------------- pure-JAX reference ----------------------------
def ffn_reference(x, p, eps=LN_EPS):
    h = jnp.maximum(jnp.einsum('bld,dh->blh', x, p['w1']) + p['b1'], 0.0)
    y = jnp.einsum('blh,hd->bld', h, p['w2']) + p['b2']
    z = y + x                                     # dropout = identity (eval)
    mu = jnp.mean(z, axis=-1, keepdims=True)
    var = jnp.mean((z - mu) ** 2, axis=-1, keepdims=True)
    return (z - mu) / jnp.sqrt(var + eps) * p['ln_g'] + p['ln_b']


# ----------------------------------- main ------------------------------------
if __name__ == "__main__":
    B, L, D_IN, D_HID = 2, 8, 32, 64

    root = jax.random.PRNGKey(0)
    pkey, xkey = jax.random.split(root)
    params, packed = init_params(pkey, D_IN, D_HID)
    x = jax.random.normal(xkey, (B, L, D_IN), F32)

    run = jax.jit(functools.partial(positionwise_ffn, d_in=D_IN, d_hid=D_HID))
    out = run(x, packed['w1'], packed['w2'], packed['pvec'])
    jax.block_until_ready(out)

    ref = ffn_reference(x, params)
    # bf16 MXU operands (f32 accumulation) vs all-f32 reference -> loosened tolerance.
    np.testing.assert_allclose(np.asarray(out), np.asarray(ref), rtol=5e-2, atol=5e-2)
    assert out.shape == (B, L, D_IN) and np.isfinite(np.asarray(out)).all()
    print("KERNEL_OK")
</pallas_src>

<mosaic_0001>
module attributes {stable_mosaic.version = 11 : i64} {
  func.func @_ffn_kernel(%arg0: i32, %arg1: memref<16x32xf32, #tpu.memory_space<vmem>>, %arg2: memref<32x64xbf16, #tpu.memory_space<vmem>>, %arg3: memref<64x32xbf16, #tpu.memory_space<vmem>>, %arg4: memref<8x64xf32, #tpu.memory_space<vmem>>, %arg5: memref<16x32xf32, #tpu.memory_space<vmem>>) attributes {dimension_semantics = [#tpu.dimension_semantics<parallel>], iteration_bounds = array<i64: 1>, scalar_prefetch = 0 : i64, scratch_operands = 0 : i64, tpu.core_type = #tpu.core_type<tc>, window_params = [{transform_indices = @transform_0, window_bounds = array<i64: 16, 32>}, {pipeline_mode = #tpu.pipeline_mode<synchronous>, transform_indices = @transform_1, window_bounds = array<i64: 32, 64>}, {pipeline_mode = #tpu.pipeline_mode<synchronous>, transform_indices = @transform_2, window_bounds = array<i64: 64, 32>}, {pipeline_mode = #tpu.pipeline_mode<synchronous>, transform_indices = @transform_3, window_bounds = array<i64: 8, 64>}, {transform_indices = @transform_4, window_bounds = array<i64: 16, 32>}]} {
    %c0 = arith.constant 0 : index
    %c0_0 = arith.constant 0 : index
    %0 = vector.load %arg1[%c0, %c0_0] : memref<16x32xf32, #tpu.memory_space<vmem>>, vector<16x32xf32>
    %c0_1 = arith.constant 0 : index
    %c0_2 = arith.constant 0 : index
    %1 = vector.load %arg4[%c0_1, %c0_2] : memref<8x64xf32, #tpu.memory_space<vmem>>, vector<1x64xf32>
    %c1 = arith.constant 1 : index
    %c0_3 = arith.constant 0 : index
    %2 = vector.load %arg4[%c1, %c0_3] : memref<8x64xf32, #tpu.memory_space<vmem>>, vector<1x32xf32>
    %c2 = arith.constant 2 : index
    %c0_4 = arith.constant 0 : index
    %3 = vector.load %arg4[%c2, %c0_4] : memref<8x64xf32, #tpu.memory_space<vmem>>, vector<1x32xf32>
    %c3 = arith.constant 3 : index
    %c0_5 = arith.constant 0 : index
    %4 = vector.load %arg4[%c3, %c0_5] : memref<8x64xf32, #tpu.memory_space<vmem>>, vector<1x32xf32>
    %5 = arith.truncf %0 : vector<16x32xf32> to vector<16x32xbf16>
    %c0_6 = arith.constant 0 : index
    %c0_7 = arith.constant 0 : index
    %6 = vector.load %arg2[%c0_6, %c0_7] : memref<32x64xbf16, #tpu.memory_space<vmem>>, vector<32x64xbf16>
    %cst = arith.constant dense<0.000000e+00> : vector<16x64xf32>
    %7 = tpu.matmul %5, %6, %cst {dimension_numbers = #tpu.dot_dimension_numbers<[1], [0], [0], [1], [0, 0, 1, 1], [], []>} : vector<16x32xbf16>, vector<32x64xbf16>, vector<16x64xf32> -> vector<16x64xf32>
    %8 = vector.broadcast %1 : vector<1x64xf32> to vector<16x64xf32>
    %9 = arith.addf %7, %8 : vector<16x64xf32>
    %cst_8 = arith.constant 0.000000e+00 : f32
    %10 = vector.broadcast %cst_8 : f32 to vector<16x64xf32>
    %11 = arith.maximumf %9, %10 : vector<16x64xf32>
    %12 = arith.truncf %11 : vector<16x64xf32> to vector<16x64xbf16>
    %c0_9 = arith.constant 0 : index
    %c0_10 = arith.constant 0 : index
    %13 = vector.load %arg3[%c0_9, %c0_10] : memref<64x32xbf16, #tpu.memory_space<vmem>>, vector<64x32xbf16>
    %cst_11 = arith.constant dense<0.000000e+00> : vector<16x32xf32>
    %14 = tpu.matmul %12, %13, %cst_11 {dimension_numbers = #tpu.dot_dimension_numbers<[1], [0], [0], [1], [0, 0, 1, 1], [], []>} : vector<16x64xbf16>, vector<64x32xbf16>, vector<16x32xf32> -> vector<16x32xf32>
    %15 = vector.broadcast %2 : vector<1x32xf32> to vector<16x32xf32>
    %16 = arith.addf %14, %15 : vector<16x32xf32>
    %17 = arith.addf %16, %0 : vector<16x32xf32>
    %cst_12 = arith.constant dense<0.000000e+00> : vector<16xf32>
    %18 = vector.multi_reduction <add>, %17, %cst_12 [1] : vector<16x32xf32> to vector<16xf32>
    %19 = vector.shape_cast %18 : vector<16xf32> to vector<16x1xf32>
    %20 = arith.mulf %17, %17 : vector<16x32xf32>
    %cst_13 = arith.constant dense<0.000000e+00> : vector<16xf32>
    %21 = vector.multi_reduction <add>, %20, %cst_13 [1] : vector<16x32xf32> to vector<16xf32>
    %22 = vector.shape_cast %21 : vector<16xf32> to vector<16x1xf32>
    %cst_14 = arith.constant 3.125000e-02 : f32
    %23 = vector.broadcast %cst_14 : f32 to vector<16x1xf32>
    %24 = arith.mulf %19, %23 : vector<16x1xf32>
    %cst_15 = arith.constant 3.125000e-02 : f32
    %25 = vector.broadcast %cst_15 : f32 to vector<16x1xf32>
    %26 = arith.mulf %22, %25 : vector<16x1xf32>
    %27 = arith.mulf %24, %24 : vector<16x1xf32>
    %28 = arith.subf %26, %27 : vector<16x1xf32>
    %29 = vector.broadcast %24 : vector<16x1xf32> to vector<16x32xf32>
    %30 = arith.subf %17, %29 : vector<16x32xf32>
    %cst_16 = arith.constant 9.99999974E-6 : f32
    %31 = vector.broadcast %cst_16 : f32 to vector<16x1xf32>
    %32 = arith.addf %28, %31 : vector<16x1xf32>
    %33 = math.rsqrt %32 : vector<16x1xf32>
    %34 = vector.broadcast %33 : vector<16x1xf32> to vector<16x32xf32>
    %35 = arith.mulf %30, %34 : vector<16x32xf32>
    %36 = vector.broadcast %3 : vector<1x32xf32> to vector<16x32xf32>
    %37 = arith.mulf %35, %36 : vector<16x32xf32>
    %38 = vector.broadcast %4 : vector<1x32xf32> to vector<16x32xf32>
    %39 = arith.addf %37, %38 : vector<16x32xf32>
    %c0_17 = arith.constant 0 : index
    %c0_18 = arith.constant 0 : index
    %40 = vector.load %arg5[%c0_17, %c0_18] : memref<16x32xf32, #tpu.memory_space<vmem>>, vector<16x32xf32>
    tpu.vector_store %arg5[%c0_17, %c0_18], %39 {strides = array<i32>} : memref<16x32xf32, #tpu.memory_space<vmem>>, vector<16x32xf32>,
    return
  }
  func.func @transform_0(%arg0: i32) -> (i32, i32) {
    %c0_i32 = arith.constant 0 : i32
    %c0_i32_0 = arith.constant 0 : i32
    return %arg0, %c0_i32 : i32, i32
  }
  func.func @transform_1(%arg0: i32) -> (i32, i32) {
    %c0_i32 = arith.constant 0 : i32
    %c0_i32_0 = arith.constant 0 : i32
    %c0_i32_1 = arith.constant 0 : i32
    return %c0_i32, %c0_i32_0 : i32, i32
  }
  func.func @transform_2(%arg0: i32) -> (i32, i32) {
    %c0_i32 = arith.constant 0 : i32
    %c0_i32_0 = arith.constant 0 : i32
    %c0_i32_1 = arith.constant 0 : i32
    return %c0_i32, %c0_i32_0 : i32, i32
  }
  func.func @transform_3(%arg0: i32) -> (i32, i32) {
    %c0_i32 = arith.constant 0 : i32
    %c0_i32_0 = arith.constant 0 : i32
    %c0_i32_1 = arith.constant 0 : i32
    return %c0_i32, %c0_i32_0 : i32, i32
  }
  func.func @transform_4(%arg0: i32) -> (i32, i32) {
    %c0_i32 = arith.constant 0 : i32
    %c0_i32_0 = arith.constant 0 : i32
    return %arg0, %c0_i32 : i32, i32
  }
}

</mosaic_0001>

<bundles_post_ra>
// kernel: positionwise_ffn.1
= control target key start
LH: loop header
LB: loop body
LE: loop exit
PB: predicated region body
PF: predicated region fallthrough
CT: control target
= control target key end

     0   :  { %vm42_vm0 = vcmask 261120   ;;  %vm96_vm1 = vcmask 523264   ;;  %s290_s1 = inlined_call_operand.vmem [shape: bf16[32,64], index: 1, kind: input, shape index: {}]   ;;  %s291_s0 = inlined_call_operand.vmem [shape: f32[16,32], index: 0, kind: input, shape index: {}, may-alias: {0,4}]   ;;  %s292_s3 = inlined_call_operand.vmem [shape: f32[8,64], index: 3, kind: input, shape index: {}]   ;;  %s293_s2 = inlined_call_operand.vmem [shape: bf16[64,32], index: 2, kind: input, shape index: {}]   ;;  %s294_s4 = inlined_call_operand.vmem [shape: f32[16,32], index: 4, kind: output, shape index: {}, may-alias: {0,4}]  }
   0x1   :  { %v203_v0 = vld [vmem:[%s290_s1 + $0x8] sm:$0xff]  ;;  %v202_v1 = vld [vmem:[%s290_s1] sm:$0xff]  ;;  %v207_v5 = vld [vmem:[%s293_s2 + $0x18] sm:$0xff] }
   0x2   :  { %v18_v2 = vld [vmem:[%s291_s0] sm:$0xff]  ;;  %52 = vmatpush.bf16.msra.mxu0 %v203_v0  ;;  %v19_v3 = vld [vmem:[%s291_s0 + $0x8] sm:$0xff]  ;;  %104 = vmatpush.bf16.msra.mxu1 %v207_v5  ;;  %v206_v6 = vld [vmem:[%s293_s2 + $0x10] sm:$0xff] }
   0x3   :  { %v24_v4 = vpack.c.bf16 %v19_v3, %v18_v2  ;;  %v205_v7 = vld [vmem:[%s293_s2 + $0x8] sm:$0xff]  ;;  %v204_v8 = vld [vmem:[%s293_s2] sm:$0xff] }
   0x4   :  { %v208_v10 = vld [vmem:[%s292_s3] ss:$0 sm:$0xff]  ;;  %v211_v17 = vld [vmem:[%s292_s3 + $0x1] ss:$0 sm:$0xff]  ;;  %v209_v52 = vld [vmem:[%s292_s3 + $0x2] ss:$0 sm:$0xff] }
   0x5   :  { %v210_v56 = vld [vmem:[%s292_s3 + $0x3] ss:$0 sm:$0xff] }
   0x6   :  { %53 = vmatpush.bf16.msra.mxu0 %v202_v1  ;;  %105 = vmatpush.bf16.msra.mxu1 %v206_v6 }
   0x9   :  { %184 = vmatmul.msk.bf16.vlgmr.msra.gmra.mxu0 %vm42_vm0, %v24_v4 }
   0xa   :  { %106 = vmatpush.bf16.msra.mxu1 %v205_v7 }
   0xe   :  { %107 = vmatpush.bf16.msra.mxu1 %v204_v8 }
  0x86   :  { %v55_v9 = vpop.f32.mrf.mxu0 }
  0x87   :  { %v56_v11 = vadd.f32 %v208_v10, %v55_v9 }
  0x89   :  { %v60_v14 = vmax.f32 %v56_v11, 0.0 }
  0x8e   :  { %v57_v12 = vpop.f32.mrf.mxu0 }
  0x8f   :  { %v58_v13 = vadd.f32 %v208_v10, %v57_v12 }
  0x91   :  { %v61_v15 = vmax.f32 %v58_v13, 0.0 }
  0x93   :  { %v62_v16 = vpack.c.bf16 %v61_v15, %v60_v14 }
  0x95   :  { %201 = vmatmul.msk.bf16.vlgmr.msra.gmra.mxu1 %vm96_vm1, %v62_v16 }
 0x112   :  { %v109_v18 = vpop.f32.mrf.mxu1 }
 0x113   :  { %v110_v19 = vadd.f32 %v211_v17, %v109_v18 }
 0x115   :  { %v114_v20 = vadd.f32 %v110_v19, %v18_v2 }
 0x117   :  { %v116_v21 = vsel %vm42_vm0, %v114_v20, 0.0  ;;  %v122_v22 = vmul.f32 %v114_v20, %v114_v20 }
 0x118   :  { %117 = vadd.xlane.f32.xlu0 %v116_v21 }
 0x119   :  { %v124_v23 = vsel %vm42_vm0, %v122_v22, 0.0 }
 0x11a   :  { %v111_v24 = vpop.f32.mrf.mxu1  ;;  %125 = vadd.xlane.f32.xlu1 %v124_v23 }
 0x11b   :  { %v112_v25 = vadd.f32 %v211_v17, %v111_v24 }
 0x11d   :  { %v115_v26 = vadd.f32 %v112_v25, %v19_v3 }
 0x11f   :  { %v119_v27 = vsel %vm42_vm0, %v115_v26, 0.0  ;;  %v123_v28 = vmul.f32 %v115_v26, %v115_v26 }
 0x120   :  { %120 = vadd.xlane.f32.xlu0 %v119_v27 }
 0x121   :  { %v127_v29 = vsel %vm42_vm0, %v123_v28, 0.0 }
 0x122   :  { %128 = vadd.xlane.f32.xlu1 %v127_v29 }
 0x18b   :  { %v118_v30 = vpop.xlane.xlu0 %117 }
 0x18c   :  { %v130_v31 = vmul.f32 0.03125, %v118_v30 }
 0x18d   :  { %v126_v32 = vpop.xlane.xlu1 %125 }
 0x18e   :  { %v134_v33 = vmul.f32 %v130_v31, %v130_v31  ;;  %v132_v34 = vmul.f32 0.03125, %v126_v32  ;;  %v138_v53 = vsub.f32 %v114_v20, %v130_v31 }
 0x190   :  { %v136_v35 = vsub.f32 %v132_v34, %v134_v33 }
 0x192   :  { %v140_v36 = vadd.f32 1e-05, %v136_v35 }
 0x193   :  { %v121_v37 = vpop.xlane.xlu0 %120 }
 0x194   :  { %212 = vrsqrt.f32 %v140_v36  ;;  %v131_v38 = vmul.f32 0.03125, %v121_v37  ;;  %vm148_vm3 = vweird.f32 %v140_v36 }
 0x195   :  { %v129_v39 = vpop.xlane.xlu1 %128 }
 0x196   :  { %v135_v40 = vmul.f32 %v131_v38, %v131_v38  ;;  %v133_v41 = vmul.f32 0.03125, %v129_v39  ;;  %v139_v63 = vsub.f32 %v115_v26, %v131_v38 }
 0x198   :  { %v137_v42 = vsub.f32 %v133_v41, %v135_v40 }
 0x19a   :  { %v213_v43 = vpop.eup %212  ;;  %v141_v44 = vadd.f32 1e-05, %v137_v42 }
 0x19b   :  { %v143_v45 = vmul.f32 %v213_v43, %v140_v36  ;;  %vm149_vm2 = vweird.f32 %v213_v43 }
 0x19c   :  { %214 = vrsqrt.f32 %v141_v44  ;;  %vm150_vm4 = vmor %vm148_vm3, %vm149_vm2  ;;  %vm158_vm6 = vweird.f32 %v141_v44 }
 0x19d   :  { %v144_v46 = vmul.f32 %v213_v43, %v143_v45 }
 0x19f   :  { %v145_v47 = vmul.f32 0.5, %v144_v46 }
 0x1a1   :  { %v146_v48 = vsub.f32 1.5, %v145_v47 }
 0x1a2   :  { %v215_v49 = vpop.eup %214 }
 0x1a3   :  { %v147_v50 = vmul.f32 %v213_v43, %v146_v48  ;;  %v153_v51 = vmul.f32 %v215_v49, %v141_v44  ;;  %vm159_vm5 = vweird.f32 %v215_v49 }
 0x1a4   :  { %vm160_vm7 = vmor %vm158_vm6, %vm159_vm5 }
 0x1a5   :  { %v151_v54 = vsel %vm150_vm4, %v213_v43, %v147_v50  ;;  %v154_v55 = vmul.f32 %v215_v49, %v153_v51 }
 0x1a6   :  { %v162_v57 = vmul.f32 %v151_v54, %v138_v53 }
 0x1a7   :  { %v155_v58 = vmul.f32 0.5, %v154_v55 }
 0x1a8   :  { %v165_v59 = vmul.f32 %v209_v52, %v162_v57 }
 0x1a9   :  { %v156_v60 = vsub.f32 1.5, %v155_v58 }
 0x1aa   :  { %v168_v61 = vadd.f32 %v210_v56, %v165_v59 }
 0x1ab   :  { %v157_v62 = vmul.f32 %v215_v49, %v156_v60 }
 0x1ac   :  { %170 = vst.msk [vmem:[%s294_s4] sm:$0xff] %vm42_vm0, %v168_v61 }
 0x1ad   :  { %v161_v0 = vsel %vm160_vm7, %v215_v49, %v157_v62 }
 0x1ae   :  { %v163_v1 = vmul.f32 %v161_v0, %v139_v63 }
 0x1b0   :  { %v166_v2 = vmul.f32 %v209_v52, %v163_v1 }
 0x1b2   :  { %v169_v3 = vadd.f32 %v210_v56, %v166_v2 }
 0x1b4   :  { %171 = vst.msk [vmem:[%s294_s4 + $0x8] sm:$0xff] %vm42_vm0, %v169_v3 }

</bundles_post_ra>
